<compile_context>
chip_gen: v7x
topology: tpu7x:2x2x1
jax: 0.10.0
libtpu: 0.0.40
codegen_flags: <defaults>
</compile_context>

<pallas_src>
import jax
import jax.numpy as jnp
from jax import lax
from jax.experimental import pallas as pl
from jax.experimental.pallas import tpu as pltpu

NUM_CLASSES = 3
HIDDEN1 = 512
HIDDEN2 = 64
HIDDEN2_PAD = 128       # lane-dense padded hidden2 (zeros beyond col 64)
SUBLANE_PAD = 8         # transposed-output sublane pad (classes in rows 0..2)
MAX_TILE_B = 2048       # amortize ~0.35 us/grid-step; ~10-12 MiB VMEM per tile
MIN_SPLIT_ROWS = 256    # only force a 2-way split if each tile gets >= this


def _round_up(x, m):
    return (x + m - 1) // m * m


def _choose_tiling(B):
    """Balanced batch tiling: small pad waste, >=2 steps for v7x when sensible.

    When the grid has more than one step the batch dimension is the *lane*
    (last) dim of the transposed output block, so tile_b must be a multiple
    of 128; with a single step the block spans the full array and only needs
    sublane (8) alignment for the feature input.
    """
    b8 = _round_up(B, 8)
    n_tiles = pl.cdiv(b8, MAX_TILE_B)
    if n_tiles < 2 and b8 >= 2 * MIN_SPLIT_ROWS:
        n_tiles = 2                       # let v7x's two TCs split the grid
    if n_tiles == 1:
        return b8, b8, 1
    tile_b = _round_up(pl.cdiv(b8, n_tiles), 128)
    return tile_b, tile_b * n_tiles, n_tiles


# --------------------------------------------------------------------------
# Pallas kernel: (folded averaging + concat + Linear1) -> ReLU -> Linear2
#                -> ReLU -> transposed Linear3, lane-dense [8, TILE_B] output
# --------------------------------------------------------------------------
def ensemble_head_kernel(x_ref, w1_ref, b1_ref, w2_ref, b2_ref,
                         w3t_ref, b3t_ref, out_ref):
    # x_ref  : [TILE_B, K]        bf16  packed (un-averaged) features
    # w1_ref : [K, 512]           bf16  row-replicated W1 with 1/L folded in
    # b1_ref : [1, 512]           f32
    # w2_ref : [512, 128]         bf16  zero-padded beyond col 64
    # b2_ref : [1, 128]           f32   zero-padded beyond col 64
    # w3t_ref: [8, 128]           bf16  W3^T, zero-padded beyond row 3 / col 64
    # b3t_ref: [8, 1]             f32   b3^T, zero-padded beyond row 3
    # out_ref: [8, TILE_B]        f32   lane-dense transposed logits

    # Linear(in_num, 512): single K-wide bf16 MXU matmul, f32 accumulation.
    h = jnp.dot(x_ref[...], w1_ref[...], preferred_element_type=jnp.float32)
    h = jnp.maximum(h + b1_ref[...], 0.0)            # bias + ReLU (f32 VPU)

    # Linear(512, 64->128 padded) + ReLU (lane-dense).
    h = jnp.dot(h.astype(jnp.bfloat16), w2_ref[...],
                preferred_element_type=jnp.float32)
    h = jnp.maximum(h + b2_ref[...], 0.0)

    # Linear(64, num_classes), computed transposed:
    #   [8, 128] x [TILE_B, 128]^T -> [8, TILE_B]  (classes on sublanes,
    #   batch on lanes) so the HBM write stream is 16x smaller yet lane-dense.
    out = lax.dot_general(
        w3t_ref[...], h.astype(jnp.bfloat16),
        dimension_numbers=(((1,), (1,)), ((), ())),
        preferred_element_type=jnp.float32)
    out_ref[...] = out + b3t_ref[...]


def ensemble_fv_head(feats_packed, head_params):
    """feats_packed: [B, K] bf16 concat of every per-model feature tensor."""
    B, K = feats_packed.shape
    tile_b, b_pad, n_tiles = _choose_tiling(B)

    x = feats_packed
    if x.dtype != jnp.bfloat16:
        # Fallback only; backbones already emit bf16 so no extra HBM pass.
        x = x.astype(jnp.bfloat16)
    if b_pad != B:
        x = jnp.pad(x, ((0, b_pad - B), (0, 0)))

    const = lambda i: (0, 0)                  # weights resident across grid
    out_t = pl.pallas_call(
        ensemble_head_kernel,
        out_shape=jax.ShapeDtypeStruct((SUBLANE_PAD, b_pad), jnp.float32),
        grid=(n_tiles,),
        in_specs=[
            pl.BlockSpec((tile_b, K), lambda i: (i, 0)),      # features (B-tiled)
            pl.BlockSpec((K, HIDDEN1), const),                # W1 (packed, bf16)
            pl.BlockSpec((1, HIDDEN1), const),                # b1
            pl.BlockSpec((HIDDEN1, HIDDEN2_PAD), const),      # W2 (padded)
            pl.BlockSpec((1, HIDDEN2_PAD), const),            # b2 (padded)
            pl.BlockSpec((SUBLANE_PAD, HIDDEN2_PAD), const),  # W3^T (padded)
            pl.BlockSpec((SUBLANE_PAD, 1), const),            # b3^T (padded)
        ],
        out_specs=pl.BlockSpec((SUBLANE_PAD, tile_b), lambda i: (0, i)),
        compiler_params=pltpu.CompilerParams(
            dimension_semantics=("parallel",),       # megacore / v7x friendly
            vmem_limit_bytes=32 * 1024 * 1024),      # raise v5e's 16 MiB default
    )(x, head_params["w1_packed"], head_params["b1"],
      head_params["w2_padded"], head_params["b2_padded"],
      head_params["w3t_padded"], head_params["b3t_padded"])

    return out_t[:NUM_CLASSES, :B].T


# --------------------------------------------------------------------------
# Glue: synthetic backbone "models" + deterministic parameter init / packing
# --------------------------------------------------------------------------
def make_synth_model(key, in_dim, feat_dim, n_feats=2):
    """Stands in for `model(x, False)` -> list of [B, feat_dim] feature tensors.

    Emits bf16 directly so the Pallas head never needs a separate cast pass
    over the packed feature slab.
    """
    keys = jax.random.split(key, n_feats)
    projs = [jax.random.normal(k, (in_dim, feat_dim), jnp.float32) * 0.05
             for k in keys]

    def apply(x_flat):
        return [jnp.tanh(x_flat @ p).astype(jnp.bfloat16) for p in projs]

    return apply


def init_fc_params(key, feat_dims):
    """Base (torch-equivalent) parameters of the nn.Sequential head."""
    in_num = sum(feat_dims)
    k1, k2, k3, k4, k5, k6 = jax.random.split(key, 6)
    return {
        "w1": jax.random.normal(k1, (in_num, HIDDEN1), jnp.float32) * 0.05,
        "b1": jax.random.normal(k2, (1, HIDDEN1), jnp.float32) * 0.05,
        "w2": jax.random.normal(k3, (HIDDEN1, HIDDEN2), jnp.float32) * 0.05,
        "b2": jax.random.normal(k4, (1, HIDDEN2), jnp.float32) * 0.05,
        "w3": jax.random.normal(k5, (HIDDEN2, NUM_CLASSES), jnp.float32) * 0.05,
        "b3": jax.random.normal(k6, (1, NUM_CLASSES), jnp.float32) * 0.05,
    }


def pack_head_params(base, feat_dims, feat_counts):
    """Pre-pack head params for the kernel (done once, outside the hot path).

    * Folds the per-model 1/len(features) averaging into W1 and replicates the
      corresponding W1 rows len(features) times, so that
          sum_j f_{i,j} @ (W1_i / L_i)  ==  mean_j(f_{i,j}) @ W1_i
      and the whole averaging+concat+Linear1 is one matmul over the packed
      (un-averaged) feature concat.
    * Zero-pads HIDDEN2 64->128 (lane-dense h2) and stores W3/b3 transposed,
      zero-padded to 8 sublanes for the lane-dense transposed output block.
    """
    w1_blocks = []
    off = 0
    for F, L in zip(feat_dims, feat_counts):
        w1_i = base["w1"][off:off + F] / float(L)
        off += F
        w1_blocks.append(jnp.tile(w1_i, (L, 1)))            # one copy per feature
    w1_packed = jnp.concatenate(w1_blocks, axis=0)           # [sum(L_i*F_i), 512]

    w2_padded = jnp.zeros((HIDDEN1, HIDDEN2_PAD), jnp.float32)
    w2_padded = w2_padded.at[:, :HIDDEN2].set(base["w2"])
    b2_padded = jnp.zeros((1, HIDDEN2_PAD), jnp.float32)
    b2_padded = b2_padded.at[:, :HIDDEN2].set(base["b2"])

    w3t_padded = jnp.zeros((SUBLANE_PAD, HIDDEN2_PAD), jnp.float32)
    w3t_padded = w3t_padded.at[:NUM_CLASSES, :HIDDEN2].set(base["w3"].T)
    b3t_padded = jnp.zeros((SUBLANE_PAD, 1), jnp.float32)
    b3t_padded = b3t_padded.at[:NUM_CLASSES, 0].set(base["b3"][0])

    return {
        "w1_packed": w1_packed.astype(jnp.bfloat16),
        "b1": base["b1"],
        "w2_padded": w2_padded.astype(jnp.bfloat16),
        "b2_padded": b2_padded,
        "w3t_padded": w3t_padded.astype(jnp.bfloat16),
        "b3t_padded": b3t_padded,
    }


def ensemble_fv_forward(x, model_fns, head_params):
    """Full EnsembleFV.forward: backbone feature lists -> Pallas head kernel."""
    B = x.shape[0]
    x_flat = x.reshape(B, -1)
    packed = []
    for fn in model_fns:                       # model(x, False) per backbone
        feats = fn(x_flat)                     # list of [B, F_i] (bf16)
        packed.append(jnp.concatenate(feats, axis=1))        # [B, L_i * F_i]
    feats_packed = jnp.concatenate(packed, axis=1)            # [B, sum(L_i*F_i)]
    return ensemble_fv_head(feats_packed, head_params)


def reference_forward(x, model_fns, base):
    """Pure-JAX f32 reference reproducing the torch semantics."""
    B = x.shape[0]
    x_flat = x.reshape(B, -1)
    ensemble = []
    for fn in model_fns:
        fs = [f.astype(jnp.float32) for f in fn(x_flat)]
        ensemble.append(sum(fs) / len(fs))
    out = jnp.concatenate(ensemble, axis=1)
    out = jnp.maximum(out @ base["w1"] + base["b1"], 0.0)
    out = jnp.maximum(out @ base["w2"] + base["b2"], 0.0)
    return out @ base["w3"] + base["b3"]


if __name__ == "__main__":
    # Small shapes consistent with the module: NCHW input, 2 backbone models,
    # each with fc.in_features = 64 and returning 2 feature tensors.
    B, C, H, W = 2, 4, 16, 16
    FEAT_DIMS = (64, 64)
    FEAT_COUNTS = (2, 2)

    root = jax.random.PRNGKey(0)
    kx, km1, km2, kfc = jax.random.split(root, 4)

    x = jax.random.normal(kx, (B, C, H, W), jnp.float32)

    model_fns = [
        make_synth_model(km1, C * H * W, FEAT_DIMS[0], n_feats=FEAT_COUNTS[0]),
        make_synth_model(km2, C * H * W, FEAT_DIMS[1], n_feats=FEAT_COUNTS[1]),
    ]
    base_params = init_fc_params(kfc, FEAT_DIMS)
    head_params = pack_head_params(base_params, FEAT_DIMS, FEAT_COUNTS)

    out = ensemble_fv_forward(x, model_fns, head_params)
    out = jax.block_until_ready(out)

    ref = reference_forward(x, model_fns, base_params)
    assert out.shape == (B, NUM_CLASSES)
    # bf16 MXU operands vs f32 reference math -> modest tolerance.
    assert jnp.allclose(out, ref, atol=1e-2, rtol=1e-2), "mismatch vs reference"

    print("KERNEL_OK")
</pallas_src>

<mosaic_0001>
module attributes {stable_mosaic.version = 11 : i64} {
  func.func @ensemble_head_kernel(%arg0: i32, %arg1: memref<8x256xbf16, #tpu.memory_space<vmem>>, %arg2: memref<256x512xbf16, #tpu.memory_space<vmem>>, %arg3: memref<1x512xf32, #tpu.memory_space<vmem>>, %arg4: memref<512x128xbf16, #tpu.memory_space<vmem>>, %arg5: memref<1x128xf32, #tpu.memory_space<vmem>>, %arg6: memref<8x128xbf16, #tpu.memory_space<vmem>>, %arg7: memref<8x1xf32, #tpu.memory_space<vmem>>, %arg8: memref<8x8xf32, #tpu.memory_space<vmem>>) attributes {dimension_semantics = [#tpu.dimension_semantics<parallel>], iteration_bounds = array<i64: 1>, scalar_prefetch = 0 : i64, scratch_operands = 0 : i64, tpu.core_type = #tpu.core_type<tc>, window_params = [{transform_indices = @transform_0, window_bounds = array<i64: 8, 256>}, {pipeline_mode = #tpu.pipeline_mode<synchronous>, transform_indices = @transform_1, window_bounds = array<i64: 256, 512>}, {pipeline_mode = #tpu.pipeline_mode<synchronous>, transform_indices = @transform_2, window_bounds = array<i64: 1, 512>}, {pipeline_mode = #tpu.pipeline_mode<synchronous>, transform_indices = @transform_3, window_bounds = array<i64: 512, 128>}, {pipeline_mode = #tpu.pipeline_mode<synchronous>, transform_indices = @transform_4, window_bounds = array<i64: 1, 128>}, {pipeline_mode = #tpu.pipeline_mode<synchronous>, transform_indices = @transform_5, window_bounds = array<i64: 8, 128>}, {pipeline_mode = #tpu.pipeline_mode<synchronous>, transform_indices = @transform_6, window_bounds = array<i64: 8, 1>}, {transform_indices = @transform_7, window_bounds = array<i64: 8, 8>}]} {
    %c0 = arith.constant 0 : index
    %c0_0 = arith.constant 0 : index
    %0 = vector.load %arg1[%c0, %c0_0] : memref<8x256xbf16, #tpu.memory_space<vmem>>, vector<8x256xbf16>
    %c0_1 = arith.constant 0 : index
    %c0_2 = arith.constant 0 : index
    %1 = vector.load %arg2[%c0_1, %c0_2] : memref<256x512xbf16, #tpu.memory_space<vmem>>, vector<256x512xbf16>
    %cst = arith.constant dense<0.000000e+00> : vector<8x512xf32>
    %2 = tpu.matmul %0, %1, %cst {dimension_numbers = #tpu.dot_dimension_numbers<[1], [0], [0], [1], [0, 0, 1, 1], [], []>} : vector<8x256xbf16>, vector<256x512xbf16>, vector<8x512xf32> -> vector<8x512xf32>
    %c0_3 = arith.constant 0 : index
    %c0_4 = arith.constant 0 : index
    %3 = vector.load %arg3[%c0_3, %c0_4] : memref<1x512xf32, #tpu.memory_space<vmem>>, vector<1x512xf32>
    %4 = vector.broadcast %3 : vector<1x512xf32> to vector<8x512xf32>
    %5 = arith.addf %2, %4 : vector<8x512xf32>
    %cst_5 = arith.constant 0.000000e+00 : f32
    %6 = vector.broadcast %cst_5 : f32 to vector<8x512xf32>
    %7 = arith.maximumf %5, %6 : vector<8x512xf32>
    %8 = arith.truncf %7 : vector<8x512xf32> to vector<8x512xbf16>
    %c0_6 = arith.constant 0 : index
    %c0_7 = arith.constant 0 : index
    %9 = vector.load %arg4[%c0_6, %c0_7] : memref<512x128xbf16, #tpu.memory_space<vmem>>, vector<512x128xbf16>
    %cst_8 = arith.constant dense<0.000000e+00> : vector<8x128xf32>
    %10 = tpu.matmul %8, %9, %cst_8 {dimension_numbers = #tpu.dot_dimension_numbers<[1], [0], [0], [1], [0, 0, 1, 1], [], []>} : vector<8x512xbf16>, vector<512x128xbf16>, vector<8x128xf32> -> vector<8x128xf32>
    %c0_9 = arith.constant 0 : index
    %c0_10 = arith.constant 0 : index
    %11 = vector.load %arg5[%c0_9, %c0_10] : memref<1x128xf32, #tpu.memory_space<vmem>>, vector<1x128xf32>
    %12 = vector.broadcast %11 : vector<1x128xf32> to vector<8x128xf32>
    %13 = arith.addf %10, %12 : vector<8x128xf32>
    %cst_11 = arith.constant 0.000000e+00 : f32
    %14 = vector.broadcast %cst_11 : f32 to vector<8x128xf32>
    %15 = arith.maximumf %13, %14 : vector<8x128xf32>
    %c0_12 = arith.constant 0 : index
    %c0_13 = arith.constant 0 : index
    %16 = vector.load %arg6[%c0_12, %c0_13] : memref<8x128xbf16, #tpu.memory_space<vmem>>, vector<8x128xbf16>
    %17 = arith.truncf %15 : vector<8x128xf32> to vector<8x128xbf16>
    %cst_14 = arith.constant dense<0.000000e+00> : vector<8x8xf32>
    %18 = tpu.matmul %16, %17, %cst_14 {dimension_numbers = #tpu.dot_dimension_numbers<[1], [1], [0], [0], [0, 0, 1, 0], [], []>} : vector<8x128xbf16>, vector<8x128xbf16>, vector<8x8xf32> -> vector<8x8xf32>
    %c0_15 = arith.constant 0 : index
    %c0_16 = arith.constant 0 : index
    %19 = vector.load %arg7[%c0_15, %c0_16] : memref<8x1xf32, #tpu.memory_space<vmem>>, vector<8x1xf32>
    %20 = vector.broadcast %19 : vector<8x1xf32> to vector<8x8xf32>
    %21 = arith.addf %18, %20 : vector<8x8xf32>
    %c0_17 = arith.constant 0 : index
    %c0_18 = arith.constant 0 : index
    %22 = vector.load %arg8[%c0_17, %c0_18] : memref<8x8xf32, #tpu.memory_space<vmem>>, vector<8x8xf32>
    tpu.vector_store %arg8[%c0_17, %c0_18], %21 {strides = array<i32>} : memref<8x8xf32, #tpu.memory_space<vmem>>, vector<8x8xf32>,
    return
  }
  func.func @transform_0(%arg0: i32) -> (i32, i32) {
    %c0_i32 = arith.constant 0 : i32
    %c0_i32_0 = arith.constant 0 : i32
    return %arg0, %c0_i32 : i32, i32
  }
  func.func @transform_1(%arg0: i32) -> (i32, i32) {
    %c0_i32 = arith.constant 0 : i32
    %c0_i32_0 = arith.constant 0 : i32
    %c0_i32_1 = arith.constant 0 : i32
    return %c0_i32, %c0_i32_0 : i32, i32
  }
  func.func @transform_2(%arg0: i32) -> (i32, i32) {
    %c0_i32 = arith.constant 0 : i32
    %c0_i32_0 = arith.constant 0 : i32
    %c0_i32_1 = arith.constant 0 : i32
    return %c0_i32, %c0_i32_0 : i32, i32
  }
  func.func @transform_3(%arg0: i32) -> (i32, i32) {
    %c0_i32 = arith.constant 0 : i32
    %c0_i32_0 = arith.constant 0 : i32
    %c0_i32_1 = arith.constant 0 : i32
    return %c0_i32, %c0_i32_0 : i32, i32
  }
  func.func @transform_4(%arg0: i32) -> (i32, i32) {
    %c0_i32 = arith.constant 0 : i32
    %c0_i32_0 = arith.constant 0 : i32
    %c0_i32_1 = arith.constant 0 : i32
    return %c0_i32, %c0_i32_0 : i32, i32
  }
  func.func @transform_5(%arg0: i32) -> (i32, i32) {
    %c0_i32 = arith.constant 0 : i32
    %c0_i32_0 = arith.constant 0 : i32
    %c0_i32_1 = arith.constant 0 : i32
    return %c0_i32, %c0_i32_0 : i32, i32
  }
  func.func @transform_6(%arg0: i32) -> (i32, i32) {
    %c0_i32 = arith.constant 0 : i32
    %c0_i32_0 = arith.constant 0 : i32
    %c0_i32_1 = arith.constant 0 : i32
    return %c0_i32, %c0_i32_0 : i32, i32
  }
  func.func @transform_7(%arg0: i32) -> (i32, i32) {
    %c0_i32 = arith.constant 0 : i32
    %c0_i32_0 = arith.constant 0 : i32
    return %c0_i32, %arg0 : i32, i32
  }
}

</mosaic_0001>

<bundles_post_ra>
// kernel: tpu_custom_call.1
= control target key start
LH: loop header
LB: loop body
LE: loop exit
PB: predicated region body
PF: predicated region fallthrough
CT: control target
= control target key end

     0   :  { %12 = vsyncpa [#allocation3], 0  ;;  %s1435_s0 = inlined_call_operand.vmem [shape: bf16[8,256], index: 0, kind: input, shape index: {}]   ;;  %s1436_s1 = inlined_call_operand.hbm [shape: bf16[256,512], index: 1, kind: input, shape index: {}]   ;;  %s1437_s2 = inlined_call_operand.vmem [shape: f32[1,512], index: 2, kind: input, shape index: {}]   ;;  %s1438_s3 = inlined_call_operand.hbm [shape: bf16[512,128], index: 3, kind: input, shape index: {}]   ;;  %s1439_s4 = inlined_call_operand.vmem [shape: f32[1,128], index: 4, kind: input, shape index: {}]   ;;  %s1440_s5 = inlined_call_operand.vmem [shape: bf16[8,128], index: 5, kind: input, shape index: {}]   ;;  %s1441_s6 = inlined_call_operand.vmem [shape: f32[8,1], index: 6, kind: input, shape index: {}]   ;;  %s1442_s7 = inlined_call_operand.hbm [shape: f32[8,8], index: 7, kind: output, shape index: {}]  }
   0x1   :  { %13 = vsyncpa [#allocation6], 0 }
   0x2   :  { %14 = vsyncpa [#allocation4], 0  ;;  %s1334_s24 = smov [#allocation2]   ;;  %s1262_s28 = scalar_lea.hbm %s1436_s1, 8192 }
   0x3   :  { %s22_s25 = sshll.u32 %s1334_s24, 4  ;;  %p1263_p0 = scmp.ne.s32.totalorder %s1436_s1, %s1262_s28  ;;  %s23_s25 = int_to_ptr.vmem [resolvable:$true] %s22_s25 }
   0x4   :  { %p1266_p1 = scmp.lt.u32.totalorder %s1262_s28, %s1436_s1 }
   0x6   :  { %p1268_p2 = pnand %p1266_p1, %p1263_p0 }
   0x8   :  { %1271 = shalt.err (!%p1268_p2)
}
   0x9   :  { %s1272_s10 = scalar_lea.vmem %s23_s25, 8192  ;;  %p1277_p4 = scmp.lt.s32.totalorder %s23_s25, %s23_s25 }
   0xa   :  { %p1273_p3 = scmp.ne.s32.totalorder %s23_s25, %s1272_s10  ;;  %p1278_p5 = scmp.lt.s32.totalorder %s1272_s10, %s1272_s10 }
   0xc   :  { %p1279_p6 = por %p1278_p5, %p1277_p4 }
   0xe   :  { %p1280_p7 = pnand %p1279_p6, %p1273_p3 }
  0x10   :  { %1283 = shalt.err (!%p1280_p7)
}
  0x11   :  { %s1335_s11 = smov 256   ;;  %s1336_s12 = smov 16  }
  0x12   :  { %28 = dma.hbm_to_vmem [thread:$0]  %s1436_s1, 8192, %s23_s25, [#allocation3], %s1335_s11, %s1335_s11, %s1336_s12  }
  0x13   :  { %s1337_s15 = smov [#allocation5]   ;;  %s1284_s19 = scalar_lea.hbm %s1438_s3, 4096 }
  0x14   :  { %s36_s16 = sshll.u32 %s1337_s15, 4  ;;  %p1285_p8 = scmp.ne.s32.totalorder %s1438_s3, %s1284_s19  ;;  %s37_s16 = int_to_ptr.vmem [resolvable:$true] %s36_s16 }
  0x15   :  { %p1288_p9 = scmp.lt.u32.totalorder %s1284_s19, %s1438_s3 }
  0x17   :  { %p1290_p10 = pnand %p1288_p9, %p1285_p8 }
  0x19   :  { %1293 = shalt.err (!%p1290_p10)
}
  0x1a   :  { %s1294_s24 = scalar_lea.vmem %s37_s16, 4096  ;;  %p1299_p12 = scmp.lt.s32.totalorder %s37_s16, %s37_s16 }
  0x1b   :  { %p1295_p11 = scmp.ne.s32.totalorder %s37_s16, %s1294_s24  ;;  %p1300_p13 = scmp.lt.s32.totalorder %s1294_s24, %s1294_s24 }
  0x1d   :  { %p1301_p0 = por %p1300_p13, %p1299_p12 }
  0x1f   :  { %p1302_p1 = pnand %p1301_p0, %p1295_p11 }
  0x21   :  { %1305 = shalt.err (!%p1302_p1)
}
  0x22   :  { %s1338_s1 = smov 64   ;;  %s1339_s25 = smov 4  }
  0x23   :  { %42 = dma.hbm_to_vmem [thread:$0]  %s1438_s3, 4096, %s37_s16, [#allocation6], %s1338_s1, %s1338_s1, %s1339_s25  }
  0x24   :  { %1328 = dma.done.wait [#allocation3], 8192  }
  0x25   :  { %1329 = vsyncadd [#allocation3], 4294959104 }
  0x26   :  { %1330 = dma.done.wait [#allocation6], 4096  }
  0x27   :  { %1331 = vsyncadd [#allocation6], 4294963200  ;;  %v1132_v0 = vld [vmem:[#allocation2 + $0x4] ss:$16 sps:$4 sm:$0xff]   ;;  %v1134_v1 = vld [vmem:[#allocation2 + $0xc] ss:$16 sps:$4 sm:$0xff]  }
  0x28   :  { %470 = vmatprep.subr.bf16.mxu0 %v1132_v0  ;;  %v1136_v2 = vld [vmem:[#allocation2] ss:$16 sps:$4 sm:$0xff]   ;;  %v1137_v3 = vld [vmem:[#allocation2 + $0x8] ss:$16 sps:$4 sm:$0xff]   ;;  %511 = vmatprep.subr.bf16.mxu1 %v1134_v1  ;;  %v1138_v4 = vld [vmem:[#allocation2 + $0x24] ss:$16 sps:$4 sm:$0xff]  }
  0x29   :  { %471 = vmatpush1.bf16.msra.mxu0 %v1136_v2  ;;  %512 = vmatpush1.bf16.msra.mxu1 %v1137_v3  ;;  %v1140_v5 = vld [vmem:[#allocation2 + $0x2c] ss:$16 sps:$4 sm:$0xff]   ;;  %v1142_v6 = vld [vmem:[#allocation2 + $0x20] ss:$16 sps:$4 sm:$0xff]   ;;  %v1143_v7 = vld [vmem:[#allocation2 + $0x28] ss:$16 sps:$4 sm:$0xff]  }
  0x2a   :  { %472 = vmatprep.subr.bf16.mxu0 %v1138_v4  ;;  %513 = vmatprep.subr.bf16.mxu1 %v1140_v5  ;;  %v1144_v8 = vld [vmem:[#allocation2 + $0x44] ss:$16 sps:$4 sm:$0xff]   ;;  %v1146_v9 = vld [vmem:[#allocation2 + $0x4c] ss:$16 sps:$4 sm:$0xff]   ;;  %v1148_v10 = vld [vmem:[#allocation2 + $0x40] ss:$16 sps:$4 sm:$0xff]  }
  0x2b   :  { %v1149_v11 = vld [vmem:[#allocation2 + $0x48] ss:$16 sps:$4 sm:$0xff]   ;;  %v1150_v12 = vld [vmem:[#allocation2 + $0x64] ss:$16 sps:$4 sm:$0xff]   ;;  %v1152_v13 = vld [vmem:[#allocation2 + $0x6c] ss:$16 sps:$4 sm:$0xff]  }
  0x2c   :  { %v1154_v14 = vld [vmem:[#allocation2 + $0x60] ss:$16 sps:$4 sm:$0xff]   ;;  %v1155_v15 = vld [vmem:[#allocation2 + $0x68] ss:$16 sps:$4 sm:$0xff]   ;;  %v1156_v16 = vld [vmem:[#allocation2 + $0x84] ss:$16 sps:$4 sm:$0xff]  }
  0x2d   :  { %473 = vmatpush1.bf16.msra.mxu0 %v1142_v6  ;;  %514 = vmatpush1.bf16.msra.mxu1 %v1143_v7  ;;  %v1158_v17 = vld [vmem:[#allocation2 + $0x8c] ss:$16 sps:$4 sm:$0xff]   ;;  %v1160_v18 = vld [vmem:[#allocation2 + $0x80] ss:$16 sps:$4 sm:$0xff]   ;;  %v1161_v19 = vld [vmem:[#allocation2 + $0x88] ss:$16 sps:$4 sm:$0xff]  }
  0x2e   :  { %474 = vmatprep.subr.bf16.mxu0 %v1144_v8  ;;  %515 = vmatprep.subr.bf16.mxu1 %v1146_v9  ;;  %v1162_v20 = vld [vmem:[#allocation2 + $0xa4] ss:$16 sps:$4 sm:$0xff]   ;;  %v1164_v21 = vld [vmem:[#allocation2 + $0xac] ss:$16 sps:$4 sm:$0xff]   ;;  %v1166_v22 = vld [vmem:[#allocation2 + $0xa0] ss:$16 sps:$4 sm:$0xff]  }
  0x2f   :  { %v1167_v23 = vld [vmem:[#allocation2 + $0xa8] ss:$16 sps:$4 sm:$0xff]   ;;  %v1168_v24 = vld [vmem:[#allocation2 + $0xc4] ss:$16 sps:$4 sm:$0xff]   ;;  %v1170_v25 = vld [vmem:[#allocation2 + $0xcc] ss:$16 sps:$4 sm:$0xff]  }
  0x30   :  { %v1172_v26 = vld [vmem:[#allocation2 + $0xc0] ss:$16 sps:$4 sm:$0xff]   ;;  %v1173_v27 = vld [vmem:[#allocation2 + $0xc8] ss:$16 sps:$4 sm:$0xff]   ;;  %v1174_v28 = vld [vmem:[#allocation2 + $0xe4] ss:$16 sps:$4 sm:$0xff]  }
  0x31   :  { %475 = vmatpush1.bf16.msra.mxu0 %v1148_v10  ;;  %516 = vmatpush1.bf16.msra.mxu1 %v1149_v11  ;;  %v1176_v29 = vld [vmem:[#allocation2 + $0xec] ss:$16 sps:$4 sm:$0xff]   ;;  %v1178_v30 = vld [vmem:[#allocation2 + $0xe0] ss:$16 sps:$4 sm:$0xff]   ;;  %v1179_v31 = vld [vmem:[#allocation2 + $0xe8] ss:$16 sps:$4 sm:$0xff]  }
  0x32   :  { %476 = vmatprep.subr.bf16.mxu0 %v1150_v12  ;;  %517 = vmatprep.subr.bf16.mxu1 %v1152_v13  ;;  %v1180_v32 = vld [vmem:[#allocation2 + $0x104] ss:$16 sps:$4 sm:$0xff]   ;;  %v1182_v33 = vld [vmem:[#allocation2 + $0x10c] ss:$16 sps:$4 sm:$0xff]   ;;  %v1184_v34 = vld [vmem:[#allocation2 + $0x100] ss:$16 sps:$4 sm:$0xff]  }
  0x33   :  { %v1185_v35 = vld [vmem:[#allocation2 + $0x108] ss:$16 sps:$4 sm:$0xff]   ;;  %v1186_v36 = vld [vmem:[#allocation2 + $0x124] ss:$16 sps:$4 sm:$0xff]   ;;  %v1188_v37 = vld [vmem:[#allocation2 + $0x12c] ss:$16 sps:$4 sm:$0xff]  }
  0x34   :  { %v1190_v38 = vld [vmem:[#allocation2 + $0x120] ss:$16 sps:$4 sm:$0xff]   ;;  %v1191_v39 = vld [vmem:[#allocation2 + $0x128] ss:$16 sps:$4 sm:$0xff]   ;;  %v1192_v40 = vld [vmem:[#allocation2 + $0x144] ss:$16 sps:$4 sm:$0xff]  }
  0x35   :  { %477 = vmatpush1.bf16.msra.mxu0 %v1154_v14  ;;  %518 = vmatpush1.bf16.msra.mxu1 %v1155_v15  ;;  %v1194_v41 = vld [vmem:[#allocation2 + $0x14c] ss:$16 sps:$4 sm:$0xff]   ;;  %v1196_v42 = vld [vmem:[#allocation2 + $0x140] ss:$16 sps:$4 sm:$0xff]   ;;  %v1197_v43 = vld [vmem:[#allocation2 + $0x148] ss:$16 sps:$4 sm:$0xff]  }
  0x36   :  { %478 = vmatprep.subr.bf16.mxu0 %v1156_v16  ;;  %519 = vmatprep.subr.bf16.mxu1 %v1158_v17  ;;  %v1198_v44 = vld [vmem:[#allocation2 + $0x164] ss:$16 sps:$4 sm:$0xff]   ;;  %v1200_v45 = vld [vmem:[#allocation2 + $0x16c] ss:$16 sps:$4 sm:$0xff]   ;;  %v1202_v46 = vld [vmem:[#allocation2 + $0x160] ss:$16 sps:$4 sm:$0xff]  }
  0x37   :  { %v56_v47 = vld [vmem:[%s1435_s0] sm:$0xff]  ;;  %v1203_v48 = vld [vmem:[#allocation2 + $0x168] ss:$16 sps:$4 sm:$0xff]   ;;  %v1206_v51 = vld [vmem:[#allocation2 + $0x18c] ss:$16 sps:$4 sm:$0xff]   ;;  %vm1341_vm0 = vmmov 0  }
  0x38   :  { %v971_v49 = vcombine.high %v56_v47, %v56_v47  ;;  %v1204_v50 = vld [vmem:[#allocation2 + $0x184] ss:$16 sps:$4 sm:$0xff]   ;;  %v1208_v52 = vld [vmem:[#allocation2 + $0x180] ss:$16 sps:$4 sm:$0xff]   ;;  %v1209_v53 = vld [vmem:[#allocation2 + $0x188] ss:$16 sps:$4 sm:$0xff]   ;;  %v970_v5 = vcombine.low %v56_v47, %v56_v47 }
  0x39   :  { %479 = vmatpush1.bf16.msra.mxu0 %v1160_v18  ;;  %520 = vmatpush1.bf16.msra.mxu1 %v1161_v19  ;;  %v1210_v54 = vld [vmem:[#allocation2 + $0x1a4] ss:$16 sps:$4 sm:$0xff]   ;;  %v1212_v55 = vld [vmem:[#allocation2 + $0x1ac] ss:$16 sps:$4 sm:$0xff]   ;;  %v1214_v56 = vld [vmem:[#allocation2 + $0x1a0] ss:$16 sps:$4 sm:$0xff]  }
  0x3a   :  { %480 = vmatprep.subr.bf16.mxu0 %v1162_v20  ;;  %521 = vmatprep.subr.bf16.mxu1 %v1164_v21  ;;  %v1215_v57 = vld [vmem:[#allocation2 + $0x1a8] ss:$16 sps:$4 sm:$0xff]   ;;  %v1216_v58 = vld [vmem:[#allocation2 + $0x1c4] ss:$16 sps:$4 sm:$0xff]   ;;  %v1218_v59 = vld [vmem:[#allocation2 + $0x1cc] ss:$16 sps:$4 sm:$0xff]  }
  0x3b   :  { %502 = vmatprep.mubr.bf16.mxu0 %v971_v49  ;;  %543 = vmatprep.mubr.bf16.mxu1 %v971_v49  ;;  %v1220_v60 = vld [vmem:[#allocation2 + $0x1c0] ss:$16 sps:$4 sm:$0xff]   ;;  %v1221_v61 = vld [vmem:[#allocation2 + $0x1c8] ss:$16 sps:$4 sm:$0xff]   ;;  %v1222_v62 = vld [vmem:[#allocation2 + $0x1e4] ss:$16 sps:$4 sm:$0xff]  }
  0x3c   :  { %v1224_v63 = vld [vmem:[#allocation2 + $0x1ec] ss:$16 sps:$4 sm:$0xff]   ;;  %v1226_v0 = vld [vmem:[#allocation2 + $0x1e0] ss:$16 sps:$4 sm:$0xff]   ;;  %v1227_v1 = vld [vmem:[#allocation2 + $0x1e8] ss:$16 sps:$4 sm:$0xff]  }
  0x3d   :  { %481 = vmatpush1.bf16.msra.mxu0 %v1166_v22  ;;  %522 = vmatpush1.bf16.msra.mxu1 %v1167_v23  ;;  %v1230_v2 = vld [vmem:[#allocation5 + $0x40] sm:$0xff]   ;;  %v1234_v7 = vld [vmem:[#allocation5 + $0x48] sm:$0xff]   ;;  %v1238_v11 = vld [vmem:[#allocation5 + $0x50] sm:$0xff]   ;;  %vm952_vm1 = vcmask 64512  }
  0x3e   :  { %482 = vmatprep.subr.bf16.mxu0 %v1168_v24  ;;  %523 = vmatprep.subr.bf16.mxu1 %v1170_v25  ;;  %v1231_v3 = vld [vmem:[#allocation5 + $0xc0] sm:$0xff]   ;;  %v1235_v8 = vld [vmem:[#allocation5 + $0xc8] sm:$0xff]   ;;  %v1239_v12 = vld [vmem:[#allocation5 + $0xd0] sm:$0xff]  }
  0x3f   :  { %v1232_v4 = vld [vmem:[#allocation5] sm:$0xff]   ;;  %v1236_v9 = vld [vmem:[#allocation5 + $0x8] sm:$0xff]   ;;  %v1240_v13 = vld [vmem:[#allocation5 + $0x10] sm:$0xff]  }
  0x40   :  { %v1233_v6 = vld [vmem:[#allocation5 + $0x80] sm:$0xff]   ;;  %v1237_v10 = vld [vmem:[#allocation5 + $0x88] sm:$0xff]   ;;  %v1241_v14 = vld [vmem:[#allocation5 + $0x90] sm:$0xff]  }
  0x41   :  { %483 = vmatpush1.bf16.msra.mxu0 %v1172_v26  ;;  %524 = vmatpush1.bf16.msra.mxu1 %v1173_v27  ;;  %v1242_v15 = vld [vmem:[#allocation5 + $0x58] sm:$0xff]   ;;  %v1246_v19 = vld [vmem:[#allocation5 + $0x60] sm:$0xff]   ;;  %v1250_v23 = vld [vmem:[#allocation5 + $0x68] sm:$0xff]  }
  0x42   :  { %484 = vmatprep.subr.bf16.mxu0 %v1174_v28  ;;  %525 = vmatprep.subr.bf16.mxu1 %v1176_v29  ;;  %v1243_v16 = vld [vmem:[#allocation5 + $0xd8] sm:$0xff]   ;;  %v1247_v20 = vld [vmem:[#allocation5 + $0xe0] sm:$0xff]   ;;  %v1251_v24 = vld [vmem:[#allocation5 + $0xe8] sm:$0xff]  }
  0x43   :  { %v1244_v17 = vld [vmem:[#allocation5 + $0x18] sm:$0xff]   ;;  %v1248_v21 = vld [vmem:[#allocation5 + $0x20] sm:$0xff]   ;;  %v1252_v25 = vld [vmem:[#allocation5 + $0x28] sm:$0xff]  }
  0x44   :  { %v1245_v18 = vld [vmem:[#allocation5 + $0x98] sm:$0xff]   ;;  %v1249_v22 = vld [vmem:[#allocation5 + $0xa0] sm:$0xff]   ;;  %v1253_v26 = vld [vmem:[#allocation5 + $0xa8] sm:$0xff]  }
  0x45   :  { %485 = vmatpush1.bf16.msra.mxu0 %v1178_v30  ;;  %526 = vmatpush1.bf16.msra.mxu1 %v1179_v31  ;;  %v1254_v27 = vld [vmem:[#allocation5 + $0x70] sm:$0xff]   ;;  %v1258_v31 = vld [vmem:[#allocation5 + $0x78] sm:$0xff]  }
  0x46   :  { %486 = vmatprep.subr.bf16.mxu0 %v1180_v32  ;;  %527 = vmatprep.subr.bf16.mxu1 %v1182_v33  ;;  %v1255_v28 = vld [vmem:[#allocation5 + $0xf0] sm:$0xff]   ;;  %v1259_v32 = vld [vmem:[#allocation5 + $0xf8] sm:$0xff]  }
  0x47   :  { %v1256_v29 = vld [vmem:[#allocation5 + $0x30] sm:$0xff]   ;;  %v1260_v33 = vld [vmem:[#allocation5 + $0x38] sm:$0xff]  }
  0x48   :  { %v1257_v30 = vld [vmem:[#allocation5 + $0xb0] sm:$0xff]  }
  0x49   :  { %487 = vmatpush1.bf16.msra.mxu0 %v1184_v34  ;;  %528 = vmatpush1.bf16.msra.mxu1 %v1185_v35  ;;  %v1261_v34 = vld [vmem:[#allocation5 + $0xb8] sm:$0xff]   ;;  %v123_v35 = vlaneseq }
  0x4a   :  { %488 = vmatprep.subr.bf16.mxu0 %v1186_v36  ;;  %529 = vmatprep.subr.bf16.mxu1 %v1188_v37 }
  0x4b   :  { %v124_v36 = vshrl.u32 %v123_v35, 7 }
  0x4d   :  { %489 = vmatpush1.bf16.msra.mxu0 %v1190_v38  ;;  %530 = vmatpush1.bf16.msra.mxu1 %v1191_v39  ;;  %v125_v37 = vsub.s32 0, %v124_v36  ;;  %v133_v38 = vsub.s32 2, %v124_v36  ;;  %v121_v39 = vld [vmem:[%s1437_s2] sm:$0xf] }
  0x4e   :  { %490 = vmatprep.subr.bf16.mxu0 %v1192_v40  ;;  %531 = vmatprep.subr.bf16.mxu1 %v1194_v41  ;;  %v129_v40 = vsub.s32 1, %v124_v36  ;;  %v137_v41 = vsub.s32 3, %v124_v36 }
  0x51   :  { %491 = vmatpush1.bf16.msra.mxu0 %v1196_v42  ;;  %532 = vmatpush1.bf16.msra.mxu1 %v1197_v43  ;;  %v126_v42 = vrot.slane %v121_v39, %v125_v37  ;;  %v134_v43 = vrot.slane %v121_v39, %v133_v38 }
  0x52   :  { %492 = vmatprep.subr.bf16.mxu0 %v1198_v44  ;;  %533 = vmatprep.subr.bf16.mxu1 %v1200_v45  ;;  %v130_v44 = vrot.slane %v121_v39, %v129_v40  ;;  %v138_v45 = vrot.slane %v121_v39, %v137_v41 }
  0x55   :  { %493 = vmatpush1.bf16.msra.mxu0 %v1202_v46  ;;  %534 = vmatpush1.bf16.msra.mxu1 %v1203_v48 }
  0x56   :  { %494 = vmatprep.subr.bf16.mxu0 %v1204_v50  ;;  %535 = vmatprep.subr.bf16.mxu1 %v1206_v51 }
  0x59   :  { %495 = vmatpush1.bf16.msra.mxu0 %v1208_v52  ;;  %536 = vmatpush1.bf16.msra.mxu1 %v1209_v53 }
  0x5a   :  { %496 = vmatprep.subr.bf16.mxu0 %v1210_v54  ;;  %537 = vmatprep.subr.bf16.mxu1 %v1212_v55 }
  0x5d   :  { %497 = vmatpush1.bf16.msra.mxu0 %v1214_v56  ;;  %538 = vmatpush1.bf16.msra.mxu1 %v1215_v57 }
  0x5e   :  { %498 = vmatprep.subr.bf16.mxu0 %v1216_v58  ;;  %539 = vmatprep.subr.bf16.mxu1 %v1218_v59 }
  0x61   :  { %499 = vmatpush1.bf16.msra.mxu0 %v1220_v60  ;;  %540 = vmatpush1.bf16.msra.mxu1 %v1221_v61 }
  0x62   :  { %500 = vmatprep.subr.bf16.mxu0 %v1222_v62  ;;  %541 = vmatprep.subr.bf16.mxu1 %v1224_v63 }
  0x65   :  { %501 = vmatpush1.bf16.msra.mxu0 %v1226_v0  ;;  %542 = vmatpush1.bf16.msra.mxu1 %v1227_v1 }
  0x66   :  { %1069 = vmatprep.subr.bf16.mxu0 %v1230_v2  ;;  %1091 = vmatprep.subr.bf16.mxu1 %v1231_v3  ;;  %v1340_v2 = vmov 0.0   ;;  %v906_v3 = vld [vmem:[%s1441_s6] sm:$0xff] }
  0x68   :  { %503 = vmatmul.mubr.bf16.vlgmr.msra.gmra.mrb[0].mxu0 %v970_v5  ;;  %544 = vmatmul.mubr.bf16.vlgmr.msra.gmra.mrb[0].mxu1 %v970_v5 }
  0x69   :  { %1070 = vmatpush3.bf16.msra.mxu0 %v1232_v4  ;;  %1092 = vmatpush3.bf16.msra.mxu1 %v1233_v6  ;;  %v1342_v4 = vmov 0  }
  0x6a   :  { %1071 = vmatprep.subr.bf16.mxu0 %v1234_v7  ;;  %1093 = vmatprep.subr.bf16.mxu1 %v1235_v8  ;;  %v1036_v7 = vld [vmem:[%s1439_s4] ss:$0 sm:$0xff]  ;;  %s1343_s4 = smov [#allocation7]  }
  0x6b   :  { %1131 = vset.pattern.permute.xlu0 %v1342_v4  ;;  %s960_s11 = sshll.u32 %s1343_s4, 4  ;;  %s961_s11 = int_to_ptr.vmem [resolvable:$true] %s960_s11 }
  0x6c   :  { %909 = vperm.xlu0 %1131, %v906_v3   ;;  %s1306_s12 = scalar_lea.vmem %s961_s11, 128  ;;  %p1311_p3 = scmp.lt.s32.totalorder %s961_s11, %s961_s11 }
  0x6d   :  { %1072 = vmatpush3.bf16.msra.mxu0 %v1236_v9  ;;  %1094 = vmatpush3.bf16.msra.mxu1 %v1237_v10  ;;  %p1307_p2 = scmp.ne.s32.totalorder %s961_s11, %s1306_s12  ;;  %p1312_p4 = scmp.lt.s32.totalorder %s1306_s12, %s1306_s12 }
  0x6e   :  { %1073 = vmatprep.subr.bf16.mxu0 %v1238_v11  ;;  %1095 = vmatprep.subr.bf16.mxu1 %v1239_v12 }
  0x6f   :  { %p1313_p5 = por %p1312_p4, %p1311_p3 }
  0x71   :  { %1074 = vmatpush3.bf16.msra.mxu0 %v1240_v13  ;;  %1096 = vmatpush3.bf16.msra.mxu1 %v1241_v14  ;;  %p1314_p6 = pnand %p1313_p5, %p1307_p2 }
  0x72   :  { %1075 = vmatprep.subr.bf16.mxu0 %v1242_v15  ;;  %1097 = vmatprep.subr.bf16.mxu1 %v1243_v16 }
  0x75   :  { %1076 = vmatpush3.bf16.msra.mxu0 %v1244_v17  ;;  %1098 = vmatpush3.bf16.msra.mxu1 %v1245_v18 }
  0x76   :  { %1077 = vmatprep.subr.bf16.mxu0 %v1246_v19  ;;  %1099 = vmatprep.subr.bf16.mxu1 %v1247_v20  ;;  %v904_v20 = vld [vmem:[%s1440_s5] sm:$0xf] }
  0x79   :  { %1078 = vmatpush3.bf16.msra.mxu0 %v1248_v21  ;;  %1100 = vmatpush3.bf16.msra.mxu1 %v1249_v22 }
  0x7a   :  { %1079 = vmatprep.subr.bf16.mxu0 %v1250_v23  ;;  %1101 = vmatprep.subr.bf16.mxu1 %v1251_v24 }
  0x7d   :  { %1080 = vmatpush3.bf16.msra.mxu0 %v1252_v25  ;;  %1102 = vmatpush3.bf16.msra.mxu1 %v1253_v26 }
  0x7e   :  { %1081 = vmatprep.subr.bf16.mxu0 %v1254_v27  ;;  %1103 = vmatprep.subr.bf16.mxu1 %v1255_v28 }
  0x81   :  { %1082 = vmatpush3.bf16.msra.mxu0 %v1256_v29  ;;  %1104 = vmatpush3.bf16.msra.mxu1 %v1257_v30 }
  0x82   :  { %1083 = vmatprep.subr.bf16.mxu0 %v1258_v31  ;;  %1105 = vmatprep.subr.bf16.mxu1 %v1259_v32 }
  0x85   :  { %1084 = vmatpush3.bf16.msra.mxu0 %v1260_v33  ;;  %1106 = vmatpush3.bf16.msra.mxu1 %v1261_v34 }
  0x86   :  { %1115 = vmatprep.subr.bf16.mxu0 %v1340_v2 }
  0xeb   :  { %v910_v21 = vpop.permute.xlu0 %909 }
 0x13b   :  { %v504_v46 = vpop.f32.mrb[0].mxu0  ;;  %v545_v47 = vpop.f32.mrb[0].mxu1 }
 0x13c   :  { %v505_v48 = vadd.f32 %v504_v46, %v126_v42  ;;  %v546_v49 = vadd.f32 %v545_v47, %v134_v43  ;;  %v506_v50 = vpop.f32.mrb[1].mxu0  ;;  %v547_v51 = vpop.f32.mrb[1].mxu1 }
 0x13d   :  { %v507_v52 = vadd.f32 %v506_v50, %v130_v44  ;;  %v548_v53 = vadd.f32 %v547_v51, %v138_v45  ;;  %v508_v54 = vpop.f32.mrb[2].mxu0  ;;  %v549_v55 = vpop.f32.mrb[2].mxu1 }
 0x13e   :  { %v552_v56 = vmax.f32 %v505_v48, 0.0  ;;  %v554_v57 = vmax.f32 %v546_v49, 0.0  ;;  %v509_v58 = vpop.f32.mrb[3].mxu0  ;;  %v550_v59 = vpop.f32.mrb[3].mxu1 }
 0x13f   :  { %v553_v60 = vmax.f32 %v507_v52, 0.0  ;;  %v555_v61 = vmax.f32 %v548_v53, 0.0 }
 0x140   :  { %v558_v62 = vpack.c.bf16 %v554_v57, %v554_v57  ;;  %v556_v1 = vpack.c.bf16 %v552_v56, %v552_v56 }
 0x141   :  { %v557_v63 = vpack.c.bf16 %v553_v60, %v553_v60  ;;  %v559_v0 = vpack.c.bf16 %v555_v61, %v555_v61 }
 0x143   :  { %855 = vmatprep.mubr.bf16.mxu0 %v557_v63  ;;  %895 = vmatprep.mubr.bf16.mxu1 %v559_v0 }
 0x144   :  { %856 = vmatmul.mubr.bf16.vlgmr.msra.gmra.mrb[4].mxu0 %v556_v1  ;;  %896 = vmatmul.mubr.bf16.vlgmr.msra.gmra.mrb[4].mxu1 %v558_v62 }
 0x145   :  { %1117 = vmatprep.mubr.msk.bf16.mxu0 %vm1341_vm0, %v1340_v2 }
 0x217   :  { %v1085_v5 = vpop.f32.mrb[4].mxu0  ;;  %v1107_v6 = vpop.f32.mrb[4].mxu1 }
 0x218   :  { %v1086_v8 = vpop.f32.mrb[5].mxu0  ;;  %v1108_v9 = vpop.f32.mrb[5].mxu1 }
 0x219   :  { %v1087_v10 = vadd.f32 %v1086_v8, %v1085_v5  ;;  %v1109_v11 = vadd.f32 %v1108_v9, %v1107_v6  ;;  %v1088_v12 = vpop.f32.mrb[6].mxu0  ;;  %v1110_v13 = vpop.f32.mrb[6].mxu1 }
 0x21a   :  { %v1089_v14 = vpop.f32.mrb[7].mxu0  ;;  %v1111_v15 = vpop.f32.mrb[7].mxu1 }
 0x21b   :  { %v858_v16 = vadd.f32 %v1087_v10, %v1036_v7 }
 0x21d   :  { %v898_v17 = vadd.f32 %v1109_v11, %v858_v16 }
 0x21f   :  { %v903_v18 = vmax.f32 %v898_v17, 0.0 }
 0x221   :  { %v905_v19 = vpack.c.bf16 %v903_v18, %v903_v18 }
 0x223   :  { %1116 = vmatpush3.bf16.xpose.msra.mxu0 %v905_v19 }
 0x22a   :  { %1118 = vmatmul.mubr.bf16.vlgmr.msra.gmra.mrb[8].mxu0 %v904_v20 }
 0x2fd   :  { %v946_v22 = vpop.f32.mrb[8].mxu0 }
 0x2fe   :  { %v947_v23 = vadd.f32 %v946_v22, %v910_v21  ;;  %v1119_v24 = vpop.f32.mrb[9].mxu0 }
 0x2ff   :  { %v949_v25 = vpop.f32.mrb[10].mxu0 }
 0x300   :  { %v1120_v26 = vpop.f32.mrb[11].mxu0  ;;  %953 = vst.msk [vmem:[#allocation7] sm:$0xff] %vm952_vm1, %v947_v23 }
 0x301   :  { %1317 = shalt.err (!%p1314_p6)
}
 0x302   :  { %s1318_s14 = scalar_lea.hbm %s1442_s7, 128 }
 0x303   :  { %p1319_p7 = scmp.ne.s32.totalorder %s1442_s7, %s1318_s14  ;;  %p1322_p8 = scmp.lt.u32.totalorder %s1318_s14, %s1442_s7 }
 0x305   :  { %p1324_p9 = pnand %p1322_p8, %p1319_p7 }
 0x307   :  { %1327 = shalt.err (!%p1324_p9)
}
 0x308   :  { %963 = dma.vmem_to_hbm [thread:$0]  %s961_s11, 128, %s1442_s7, [#allocation4]  }
 0x309   :  { %1332 = dma.done.wait [#allocation4], 128  }
 0x30a   :  { %1333 = vsyncadd [#allocation4], 4294967168 }
 0x30b   :  { %967 = vsyncpa [#allocation3], 1 }
 0x30c   :  { %968 = vsyncpa [#allocation6], 1 }
 0x30d   :  { %969 = vsyncpa [#allocation4], 1 }

</bundles_post_ra>
